<compile_context>
chip_gen: v5e
topology: v5e:2x2
jax: 0.10.0
libtpu: 0.0.40
codegen_flags: <defaults>
</compile_context>

<pallas_src>
import functools

import jax
import jax.numpy as jnp
from jax.experimental import pallas as pl
from jax.experimental.pallas import tpu as pltpu

HIDDEN = 64
LANE = 128
TILE_B_MAX = 512  # batch rows per grid step (mem-bound: amortize per-step overhead)


def _round_up(n, m):
    return ((n + m - 1) // m) * m


def _dqn_kernel(x_ref, w1_ref, b1_ref, w2_ref, b2_ref, w3_ref, b3_ref, o_ref):
    """Fused 3-layer MLP on one batch tile: relu(x@W1+b1) -> relu(.@W2+b2) -> .@W3+b3."""
    x = x_ref[...]  # bf16 [tile_b, in_dim] — fed straight to the MXU, no up-cast
    h1 = jnp.dot(x, w1_ref[...], preferred_element_type=jnp.float32) + b1_ref[...]
    h1 = jnp.maximum(h1, 0.0).astype(jnp.bfloat16)
    h2 = jnp.dot(h1, w2_ref[...], preferred_element_type=jnp.float32) + b2_ref[...]
    h2 = jnp.maximum(h2, 0.0).astype(jnp.bfloat16)
    out = jnp.dot(h2, w3_ref[...], preferred_element_type=jnp.float32) + b3_ref[...]
    o_ref[...] = out.astype(o_ref.dtype)


def prepare_params(params):
    """Zero-pad hidden/output dims to lane-dense multiples of 128; cast weights to bf16.

    Padded hidden units get zero weights AND zero bias, so relu(0)=0 and they
    contribute nothing downstream; padded output columns are sliced off in the
    wrapper. Real-unit results are unchanged (up to bf16 rounding of operands).
    """
    w1, b1, w2, b2, w3, b3 = params
    in_dim, hidden = w1.shape
    out_dim = w3.shape[1]
    hp = _round_up(hidden, LANE)
    op = _round_up(out_dim, LANE)

    def pad2(a, shape):
        buf = jnp.zeros(shape, a.dtype)
        return buf.at[: a.shape[0], : a.shape[1]].set(a)

    w1p = pad2(w1, (in_dim, hp)).astype(jnp.bfloat16)
    w2p = pad2(w2, (hp, hp)).astype(jnp.bfloat16)
    w3p = pad2(w3, (hp, op)).astype(jnp.bfloat16)
    b1p = pad2(b1, (1, hp)).astype(jnp.float32)
    b2p = pad2(b2, (1, hp)).astype(jnp.float32)
    b3p = pad2(b3, (1, op)).astype(jnp.float32)
    return (w1p, b1p, w2p, b2p, w3p, b3p), out_dim


@functools.partial(jax.jit, static_argnames=("out_dim",))
def dqn_forward(x, prepared, out_dim):
    """Runs the fused DQN forward pass. x: [B, input_dim] float32."""
    w1, b1, w2, b2, w3, b3 = prepared
    B, in_dim = x.shape
    hp = w1.shape[1]
    op = w3.shape[1]

    # Pad the batch to a bf16-sublane-friendly multiple (16), pick a batch tile,
    # and round the batch up to a whole number of tiles. Weight blocks use
    # constant block indices, so they are fetched once and stay VMEM-resident.
    b_pad = _round_up(max(B, 16), 16)
    tile_b = min(TILE_B_MAX, b_pad)
    b_pad = _round_up(b_pad, tile_b)
    grid = (b_pad // tile_b,)

    xp = jnp.zeros((b_pad, in_dim), jnp.bfloat16).at[:B].set(x.astype(jnp.bfloat16))

    flops = 2 * b_pad * (in_dim * hp + hp * hp + hp * op)
    bytes_accessed = (
        xp.size * 2
        + (w1.size + w2.size + w3.size) * 2
        + (b1.size + b2.size + b3.size) * 4
        + b_pad * op * 4
    )

    def const(shape):  # weights / biases: same block every grid step
        return pl.BlockSpec(shape, lambda i: (0, 0))

    out_padded = pl.pallas_call(
        _dqn_kernel,
        out_shape=jax.ShapeDtypeStruct((b_pad, op), jnp.float32),
        grid=grid,
        in_specs=[
            pl.BlockSpec((tile_b, in_dim), lambda i: (i, 0)),  # x tiled over batch
            const((in_dim, hp)),
            const((1, hp)),
            const((hp, hp)),
            const((1, hp)),
            const((hp, op)),
            const((1, op)),
        ],
        out_specs=pl.BlockSpec((tile_b, op), lambda i: (i, 0)),  # lane-dense store
        compiler_params=pltpu.CompilerParams(
            # batch tiles are independent -> shard across TensorCores on v7x
            dimension_semantics=("parallel",),
        ),
        cost_estimate=pl.CostEstimate(
            flops=flops, transcendentals=0, bytes_accessed=bytes_accessed
        ),
    )(xp, w1, b1, w2, b2, w3, b3)

    return out_padded[:B, :out_dim]


def init_dqn_params(key, input_dim, output_dim, hidden=HIDDEN):
    """Deterministic init mimicking PyTorch nn.Linear default (U[-1/sqrt(fan_in), +])."""
    ks = jax.random.split(key, 6)

    def linear(kw, kb, fan_in, fan_out):
        bound = 1.0 / jnp.sqrt(jnp.float32(fan_in))
        # Stored as [in, out] (transposed vs. PyTorch's [out, in]) for x @ W.
        w = jax.random.uniform(kw, (fan_in, fan_out), jnp.float32, -bound, bound)
        b = jax.random.uniform(kb, (1, fan_out), jnp.float32, -bound, bound)
        return w, b

    w1, b1 = linear(ks[0], ks[1], input_dim, hidden)
    w2, b2 = linear(ks[2], ks[3], hidden, hidden)
    w3, b3 = linear(ks[4], ks[5], hidden, output_dim)
    return (w1, b1, w2, b2, w3, b3)


def dqn_reference(x, params):
    """Pure-JAX f32 reference matching the PyTorch module semantics."""
    w1, b1, w2, b2, w3, b3 = params
    h1 = jnp.maximum(x @ w1 + b1, 0.0)
    h2 = jnp.maximum(h1 @ w2 + b2, 0.0)
    return h2 @ w3 + b3


if __name__ == "__main__":
    key = jax.random.PRNGKey(0)
    k_param, k_x1, k_x2 = jax.random.split(key, 3)

    input_dim = 16   # e.g. state dimension
    output_dim = 4   # e.g. number of actions

    params = init_dqn_params(k_param, input_dim, output_dim)
    prepared, out_dim = prepare_params(params)

    # Small batch: single grid step.
    batch = 8
    x = jax.random.normal(k_x1, (batch, input_dim), dtype=jnp.float32)
    out = jax.block_until_ready(dqn_forward(x, prepared, out_dim))
    ref = dqn_reference(x, params)
    assert out.shape == (batch, output_dim)
    # bf16 matmul operands (f32 accumulation) -> loose tolerance vs f32 reference.
    assert jnp.allclose(out, ref, atol=5e-2, rtol=5e-2), "mismatch vs reference (B=8)"

    # Larger, non-tile-aligned batch: exercises multi-step grid + batch padding.
    batch2 = 640
    x2 = jax.random.normal(k_x2, (batch2, input_dim), dtype=jnp.float32)
    out2 = jax.block_until_ready(dqn_forward(x2, prepared, out_dim))
    ref2 = dqn_reference(x2, params)
    assert out2.shape == (batch2, output_dim)
    assert jnp.allclose(out2, ref2, atol=5e-2, rtol=5e-2), "mismatch vs reference (B=640)"

    print("KERNEL_OK")
</pallas_src>

<mosaic_0001>
module attributes {stable_mosaic.version = 11 : i64} {
  func.func @_dqn_kernel(%arg0: i32, %arg1: memref<16x16xbf16, #tpu.memory_space<vmem>>, %arg2: memref<16x128xbf16, #tpu.memory_space<vmem>>, %arg3: memref<1x128xf32, #tpu.memory_space<vmem>>, %arg4: memref<128x128xbf16, #tpu.memory_space<vmem>>, %arg5: memref<1x128xf32, #tpu.memory_space<vmem>>, %arg6: memref<128x128xbf16, #tpu.memory_space<vmem>>, %arg7: memref<1x128xf32, #tpu.memory_space<vmem>>, %arg8: memref<16x128xf32, #tpu.memory_space<vmem>>) attributes {dimension_semantics = [#tpu.dimension_semantics<parallel>], iteration_bounds = array<i64: 1>, scalar_prefetch = 0 : i64, scratch_operands = 0 : i64, tpu.core_type = #tpu.core_type<tc>, window_params = [{transform_indices = @transform_0, window_bounds = array<i64: 16, 16>}, {pipeline_mode = #tpu.pipeline_mode<synchronous>, transform_indices = @transform_1, window_bounds = array<i64: 16, 128>}, {pipeline_mode = #tpu.pipeline_mode<synchronous>, transform_indices = @transform_2, window_bounds = array<i64: 1, 128>}, {pipeline_mode = #tpu.pipeline_mode<synchronous>, transform_indices = @transform_3, window_bounds = array<i64: 128, 128>}, {pipeline_mode = #tpu.pipeline_mode<synchronous>, transform_indices = @transform_4, window_bounds = array<i64: 1, 128>}, {pipeline_mode = #tpu.pipeline_mode<synchronous>, transform_indices = @transform_5, window_bounds = array<i64: 128, 128>}, {pipeline_mode = #tpu.pipeline_mode<synchronous>, transform_indices = @transform_6, window_bounds = array<i64: 1, 128>}, {transform_indices = @transform_7, window_bounds = array<i64: 16, 128>}]} {
    %c0 = arith.constant 0 : index
    %c0_0 = arith.constant 0 : index
    %0 = vector.load %arg1[%c0, %c0_0] : memref<16x16xbf16, #tpu.memory_space<vmem>>, vector<16x16xbf16>
    %c0_1 = arith.constant 0 : index
    %c0_2 = arith.constant 0 : index
    %1 = vector.load %arg2[%c0_1, %c0_2] : memref<16x128xbf16, #tpu.memory_space<vmem>>, vector<16x128xbf16>
    %cst = arith.constant dense<0.000000e+00> : vector<16x128xf32>
    %2 = tpu.matmul %0, %1, %cst {dimension_numbers = #tpu.dot_dimension_numbers<[1], [0], [0], [1], [0, 0, 1, 1], [], []>} : vector<16x16xbf16>, vector<16x128xbf16>, vector<16x128xf32> -> vector<16x128xf32>
    %c0_3 = arith.constant 0 : index
    %c0_4 = arith.constant 0 : index
    %3 = vector.load %arg3[%c0_3, %c0_4] : memref<1x128xf32, #tpu.memory_space<vmem>>, vector<1x128xf32>
    %4 = vector.broadcast %3 : vector<1x128xf32> to vector<16x128xf32>
    %5 = arith.addf %2, %4 : vector<16x128xf32>
    %cst_5 = arith.constant 0.000000e+00 : f32
    %6 = vector.broadcast %cst_5 : f32 to vector<16x128xf32>
    %7 = arith.maximumf %5, %6 : vector<16x128xf32>
    %8 = arith.truncf %7 : vector<16x128xf32> to vector<16x128xbf16>
    %c0_6 = arith.constant 0 : index
    %c0_7 = arith.constant 0 : index
    %9 = vector.load %arg4[%c0_6, %c0_7] : memref<128x128xbf16, #tpu.memory_space<vmem>>, vector<128x128xbf16>
    %cst_8 = arith.constant dense<0.000000e+00> : vector<16x128xf32>
    %10 = tpu.matmul %8, %9, %cst_8 {dimension_numbers = #tpu.dot_dimension_numbers<[1], [0], [0], [1], [0, 0, 1, 1], [], []>} : vector<16x128xbf16>, vector<128x128xbf16>, vector<16x128xf32> -> vector<16x128xf32>
    %c0_9 = arith.constant 0 : index
    %c0_10 = arith.constant 0 : index
    %11 = vector.load %arg5[%c0_9, %c0_10] : memref<1x128xf32, #tpu.memory_space<vmem>>, vector<1x128xf32>
    %12 = vector.broadcast %11 : vector<1x128xf32> to vector<16x128xf32>
    %13 = arith.addf %10, %12 : vector<16x128xf32>
    %cst_11 = arith.constant 0.000000e+00 : f32
    %14 = vector.broadcast %cst_11 : f32 to vector<16x128xf32>
    %15 = arith.maximumf %13, %14 : vector<16x128xf32>
    %16 = arith.truncf %15 : vector<16x128xf32> to vector<16x128xbf16>
    %c0_12 = arith.constant 0 : index
    %c0_13 = arith.constant 0 : index
    %17 = vector.load %arg6[%c0_12, %c0_13] : memref<128x128xbf16, #tpu.memory_space<vmem>>, vector<128x128xbf16>
    %cst_14 = arith.constant dense<0.000000e+00> : vector<16x128xf32>
    %18 = tpu.matmul %16, %17, %cst_14 {dimension_numbers = #tpu.dot_dimension_numbers<[1], [0], [0], [1], [0, 0, 1, 1], [], []>} : vector<16x128xbf16>, vector<128x128xbf16>, vector<16x128xf32> -> vector<16x128xf32>
    %c0_15 = arith.constant 0 : index
    %c0_16 = arith.constant 0 : index
    %19 = vector.load %arg7[%c0_15, %c0_16] : memref<1x128xf32, #tpu.memory_space<vmem>>, vector<1x128xf32>
    %20 = vector.broadcast %19 : vector<1x128xf32> to vector<16x128xf32>
    %21 = arith.addf %18, %20 : vector<16x128xf32>
    %c0_17 = arith.constant 0 : index
    %c0_18 = arith.constant 0 : index
    %22 = vector.load %arg8[%c0_17, %c0_18] : memref<16x128xf32, #tpu.memory_space<vmem>>, vector<16x128xf32>
    tpu.vector_store %arg8[%c0_17, %c0_18], %21 {strides = array<i32>} : memref<16x128xf32, #tpu.memory_space<vmem>>, vector<16x128xf32>,
    return
  }
  func.func @transform_0(%arg0: i32) -> (i32, i32) {
    %c0_i32 = arith.constant 0 : i32
    %c0_i32_0 = arith.constant 0 : i32
    return %arg0, %c0_i32 : i32, i32
  }
  func.func @transform_1(%arg0: i32) -> (i32, i32) {
    %c0_i32 = arith.constant 0 : i32
    %c0_i32_0 = arith.constant 0 : i32
    %c0_i32_1 = arith.constant 0 : i32
    return %c0_i32, %c0_i32_0 : i32, i32
  }
  func.func @transform_2(%arg0: i32) -> (i32, i32) {
    %c0_i32 = arith.constant 0 : i32
    %c0_i32_0 = arith.constant 0 : i32
    %c0_i32_1 = arith.constant 0 : i32
    return %c0_i32, %c0_i32_0 : i32, i32
  }
  func.func @transform_3(%arg0: i32) -> (i32, i32) {
    %c0_i32 = arith.constant 0 : i32
    %c0_i32_0 = arith.constant 0 : i32
    %c0_i32_1 = arith.constant 0 : i32
    return %c0_i32, %c0_i32_0 : i32, i32
  }
  func.func @transform_4(%arg0: i32) -> (i32, i32) {
    %c0_i32 = arith.constant 0 : i32
    %c0_i32_0 = arith.constant 0 : i32
    %c0_i32_1 = arith.constant 0 : i32
    return %c0_i32, %c0_i32_0 : i32, i32
  }
  func.func @transform_5(%arg0: i32) -> (i32, i32) {
    %c0_i32 = arith.constant 0 : i32
    %c0_i32_0 = arith.constant 0 : i32
    %c0_i32_1 = arith.constant 0 : i32
    return %c0_i32, %c0_i32_0 : i32, i32
  }
  func.func @transform_6(%arg0: i32) -> (i32, i32) {
    %c0_i32 = arith.constant 0 : i32
    %c0_i32_0 = arith.constant 0 : i32
    %c0_i32_1 = arith.constant 0 : i32
    return %c0_i32, %c0_i32_0 : i32, i32
  }
  func.func @transform_7(%arg0: i32) -> (i32, i32) {
    %c0_i32 = arith.constant 0 : i32
    %c0_i32_0 = arith.constant 0 : i32
    return %arg0, %c0_i32 : i32, i32
  }
}

</mosaic_0001>

<bundles_post_ra>
// kernel: dqn_forward.1
= control target key start
LH: loop header
LB: loop body
LE: loop exit
PB: predicated region body
PF: predicated region fallthrough
CT: control target
= control target key end

     0   :  { %12 = vsyncpa [#allocation3], 0  ;;  %s495_s0 = inlined_call_operand.vmem [shape: bf16[16,16], index: 0, kind: input, shape index: {}]   ;;  %s496_s1 = inlined_call_operand.vmem [shape: bf16[16,128], index: 1, kind: input, shape index: {}]   ;;  %s497_s2 = inlined_call_operand.vmem [shape: f32[1,128], index: 2, kind: input, shape index: {}]   ;;  %s498_s3 = inlined_call_operand.hbm [shape: bf16[128,128], index: 3, kind: input, shape index: {}]   ;;  %s499_s4 = inlined_call_operand.vmem [shape: f32[1,128], index: 4, kind: input, shape index: {}]   ;;  %s500_s5 = inlined_call_operand.hbm [shape: bf16[128,128], index: 5, kind: input, shape index: {}]   ;;  %s501_s6 = inlined_call_operand.vmem [shape: f32[1,128], index: 6, kind: input, shape index: {}]   ;;  %s502_s7 = inlined_call_operand.vmem [shape: f32[16,128], index: 7, kind: output, shape index: {}]  }
   0x1   :  { %s24_s26 = sshll.u32 %s498_s3, 4  ;;  %s25_s26 = int_to_ptr.hbm [resolvable:$true] %s24_s26 }
   0x2   :  { %13 = vsyncpa [#allocation5], 0  ;;  %s424_s27 = smov [#allocation2]   ;;  %s39_s8 = sshll.u32 %s500_s5, 4  ;;  %s40_s8 = int_to_ptr.hbm [resolvable:$true] %s39_s8 }
   0x3   :  { %s26_s28 = sshll.u32 %s424_s27, 4  ;;  %s425_s9 = smov 64   ;;  %s27_s28 = int_to_ptr.vmem [resolvable:$true] %s26_s28 }
   0x4   :  { %s426_s10 = smov 4   ;;  %s427_s11 = smov [#allocation4]  }
   0x5   :  { %32 = dma.hbm_to_vmem [thread:$0]  %s25_s26, 1024, %s27_s28, [#allocation3], %s425_s9, %s425_s9, %s426_s10  }
   0x6   :  { %s41_s12 = sshll.u32 %s427_s11, 4  ;;  %s42_s12 = int_to_ptr.vmem [resolvable:$true] %s41_s12 }
   0x7   :  { %47 = dma.hbm_to_vmem [thread:$0]  %s40_s8, 1024, %s42_s12, [#allocation5], %s425_s9, %s425_s9, %s426_s10  }
   0x8   :  { %420 = dma.done.wait [#allocation3], 1024  }
   0x9   :  { %421 = vsyncadd [#allocation3], 4294966272 }
   0xa   :  { %422 = dma.done.wait [#allocation5], 1024  }
   0xb   :  { %423 = vsyncadd [#allocation5], 4294966272  ;;  %v348_v0 = vld [vmem:[%s496_s1] sm:$0xff]  ;;  %v356_v1 = vld [vmem:[#allocation2 + $0x38] sm:$0xff]  ;;  %vm78_vm0 = vcmask 130048  }
   0xc   :  { %v347_v2 = vld [vmem:[%s495_s0] sm:$0xff]  ;;  %89 = vmatpush.bf16.msra.mxu0 %v348_v0  ;;  %167 = vmatpush.bf16.msra.mxu1 %v356_v1  ;;  %v355_v3 = vld [vmem:[#allocation2 + $0x30] sm:$0xff]  ;;  %v354_v4 = vld [vmem:[#allocation2 + $0x28] sm:$0xff] }
   0xd   :  { %v353_v5 = vld [vmem:[#allocation2 + $0x20] sm:$0xff]  ;;  %v352_v6 = vld [vmem:[#allocation2 + $0x18] sm:$0xff]  ;;  %v351_v7 = vld [vmem:[#allocation2 + $0x10] sm:$0xff] }
   0xe   :  { %v350_v8 = vld [vmem:[#allocation2 + $0x8] sm:$0xff]  ;;  %v349_v9 = vld [vmem:[#allocation2] sm:$0xff]  ;;  %v364_v10 = vld [vmem:[#allocation4 + $0x38] sm:$0xff] }
   0xf   :  { %282 = vmatmul.msk.bf16.vlgmr.msra.gmra.mxu0 %vm78_vm0, %v347_v2  ;;  %252 = vmatpush.bf16.msra.mxu2 %v364_v10  ;;  %v363_v11 = vld [vmem:[#allocation4 + $0x30] sm:$0xff]  ;;  %v362_v12 = vld [vmem:[#allocation4 + $0x28] sm:$0xff]  ;;  %v361_v13 = vld [vmem:[#allocation4 + $0x20] sm:$0xff] }
  0x10   :  { %168 = vmatpush.bf16.msra.mxu1 %v355_v3  ;;  %v369_v15 = vld [vmem:[%s497_s2] ss:$0 sm:$0xff]  ;;  %v360_v22 = vld [vmem:[#allocation4 + $0x18] sm:$0xff]  ;;  %v359_v23 = vld [vmem:[#allocation4 + $0x10] sm:$0xff] }
  0x11   :  { %v358_v24 = vld [vmem:[#allocation4 + $0x8] sm:$0xff]  ;;  %v357_v25 = vld [vmem:[#allocation4] sm:$0xff] }
  0x12   :  { %v370_v27 = vld [vmem:[%s499_s4] ss:$0 sm:$0xff] }
  0x13   :  { %253 = vmatpush.bf16.msra.mxu2 %v363_v11  ;;  %v371_v34 = vld [vmem:[%s501_s6] ss:$0 sm:$0xff] }
  0x14   :  { %169 = vmatpush.bf16.msra.mxu1 %v354_v4 }
  0x17   :  { %254 = vmatpush.bf16.msra.mxu2 %v362_v12 }
  0x18   :  { %170 = vmatpush.bf16.msra.mxu1 %v353_v5 }
  0x1b   :  { %255 = vmatpush.bf16.msra.mxu2 %v361_v13 }
  0x1c   :  { %171 = vmatpush.bf16.msra.mxu1 %v352_v6 }
  0x1f   :  { %256 = vmatpush.bf16.msra.mxu2 %v360_v22 }
  0x20   :  { %172 = vmatpush.bf16.msra.mxu1 %v351_v7 }
  0x23   :  { %257 = vmatpush.bf16.msra.mxu2 %v359_v23 }
  0x24   :  { %173 = vmatpush.bf16.msra.mxu1 %v350_v8 }
  0x27   :  { %258 = vmatpush.bf16.msra.mxu2 %v358_v24 }
  0x28   :  { %174 = vmatpush.bf16.msra.mxu1 %v349_v9 }
  0x2b   :  { %259 = vmatpush.bf16.msra.mxu2 %v357_v25 }
  0x8c   :  { %v91_v14 = vpop.f32.mrf.mxu0 }
  0x8d   :  { %v92_v16 = vadd.f32 %v369_v15, %v91_v14 }
  0x8f   :  { %v96_v19 = vmax.f32 %v92_v16, 0.0 }
  0x94   :  { %v93_v17 = vpop.f32.mrf.mxu0 }
  0x95   :  { %v94_v18 = vadd.f32 %v369_v15, %v93_v17 }
  0x97   :  { %v97_v20 = vmax.f32 %v94_v18, 0.0 }
  0x99   :  { %v98_v21 = vpack.c.bf16 %v97_v20, %v96_v19 }
  0x9b   :  { %175 = vmatmul.bf16.vlgmr.msra.gmra.mxu1 %v98_v21 }
 0x118   :  { %v176_v26 = vpop.f32.mrf.mxu1 }
 0x119   :  { %v177_v28 = vadd.f32 %v370_v27, %v176_v26 }
 0x11b   :  { %v181_v31 = vmax.f32 %v177_v28, 0.0 }
 0x120   :  { %v178_v29 = vpop.f32.mrf.mxu1 }
 0x121   :  { %v179_v30 = vadd.f32 %v370_v27, %v178_v29 }
 0x123   :  { %v182_v32 = vmax.f32 %v179_v30, 0.0 }
 0x125   :  { %v183_v33 = vpack.c.bf16 %v182_v32, %v181_v31 }
 0x127   :  { %260 = vmatmul.bf16.vlgmr.msra.gmra.mxu2 %v183_v33 }
 0x1aa   :  { %v261_v35 = vpop.f32.mrf.mxu2 }
 0x1ab   :  { %v262_v36 = vadd.f32 %v371_v34, %v261_v35 }
 0x1ad   :  { %266 = vst [vmem:[%s502_s7] sm:$0xff] %v262_v36 }
 0x1b2   :  { %v263_v37 = vpop.f32.mrf.mxu2 }
 0x1b3   :  { %v264_v38 = vadd.f32 %v371_v34, %v263_v37 }
 0x1b5   :  { %267 = vst [vmem:[%s502_s7 + $0x8] sm:$0xff] %v264_v38 }
 0x1b6   :  { %272 = vsyncpa [#allocation3], 1 }
 0x1b7   :  { %273 = vsyncpa [#allocation5], 1 }

</bundles_post_ra>
